<compile_context>
chip_gen: v7x
topology: tpu7x:2x2x1
jax: 0.10.0
libtpu: 0.0.40
codegen_flags: <defaults>
</compile_context>

<pallas_src>
import functools

import jax
import jax.numpy as jnp
from jax.experimental import pallas as pl
from jax.experimental.pallas import tpu as pltpu

_LANE = 128
_SUBLANE = 8


def _round_up(x, m):
    return -(-x // m) * m


def _device_kind():
    try:
        return jax.devices()[0].device_kind.lower()
    except Exception:
        return ""


def _per_input_tile_bytes():
    """Per-input, per-grid-step HBM tile budget, by TPU generation."""
    kind = _device_kind()
    if "v7" in kind:
        return 8 << 20   # 3.2 TB/s HBM -> bigger steps to amortize overhead
    if "v6" in kind:
        return 4 << 20
    if "v5" in kind:
        return 2 << 20   # tighter scoped-VMEM default
    return 4 << 20


def _num_tensorcores():
    return 2 if "v7" in _device_kind() else 1


def _dice_kernel(p_ref, t_ref, num_ref, den_ref, *, d, td, bpc, grid_d,
                 needs_mask, skip_dup):
    """Streaming per-row reduction: num += sum(p*t), den += sum(p+t)."""
    c = pl.program_id(1)   # reduction-chunk axis (size 1 or 2)
    k = pl.program_id(2)   # reduction (D) axis within the chunk

    @pl.when(k == 0)
    def _init():
        num_ref[...] = jnp.zeros_like(num_ref)
        den_ref[...] = jnp.zeros_like(den_ref)

    def _accumulate():
        p = p_ref[...].astype(jnp.float32)   # (bn, td) — cast after load
        t = t_ref[...].astype(jnp.float32)
        if needs_mask:
            # Tail blocks hold unspecified data past column `d`: mask it.
            k_global = c * bpc + k
            col = jax.lax.broadcasted_iota(jnp.int32, p.shape, dimension=1)
            valid = (col + k_global * td) < d
            p = jnp.where(valid, p, 0.0)
            t = jnp.where(valid, t, 0.0)
        num_ref[...] += jnp.sum(p * t, axis=-1, keepdims=True)
        den_ref[...] += jnp.sum(p + t, axis=-1, keepdims=True)

    if skip_dup:
        # Last chunk may be issued a clamped duplicate block: skip it.
        pl.when(c * bpc + k < grid_d)(_accumulate)
    else:
        _accumulate()


def binary_dice_loss(predict, target, smooth=1, p=2, reduction="mean",
                     target_tile_bytes=None, num_reduction_chunks=None):
    """Pallas implementation of BinaryDiceLoss.forward.

    Masked mean over batch entries with target.reshape(N,-1)[:, 0] != -1,
    exactly as in the reference module.  Inputs may be any dtype (bf16/int8
    targets are streamed as-is and cast in-kernel).
    """
    # TODO(synk): `p` (power) and `reduction` are unused in the reference
    # forward (den uses plain sums, the masked mean is hard-coded); reproduced
    # faithfully.
    assert predict.shape[0] == target.shape[0], "batch size mismatch"
    n = predict.shape[0]
    p2 = predict.reshape(n, -1)
    t2 = target.reshape(n, -1)
    d = p2.shape[1]

    isz_p = jnp.dtype(p2.dtype).itemsize
    isz_t = jnp.dtype(t2.dtype).itemsize
    itemsize = max(isz_p, isz_t)
    tile_bytes = int(target_tile_bytes or _per_input_tile_bytes())
    budget_elems = max(_LANE, tile_bytes // itemsize)
    d_lanes = _round_up(d, _LANE)

    # ---- tiling: (bn rows, td columns) per grid step, ~tile_bytes/input ----
    if d_lanes * _SUBLANE > budget_elems:
        # Large rows: few rows per step, stream D in balanced 128-aligned slices.
        bn = n if n < _SUBLANE else _SUBLANE
        per_row = max(_LANE, (budget_elems // bn) // _LANE * _LANE)
        if per_row >= d:
            td, grid_d = d, 1
        else:
            grid_d = -(-d // per_row)
            td = _round_up(-(-d // grid_d), _LANE)   # balanced: waste <= 127/row
            if td >= d:
                td, grid_d = d, 1
            else:
                grid_d = -(-d // td)
    else:
        # Small rows: whole row per step, block the batch dim to amortize
        # per-step overhead with large contiguous DMAs.
        td, grid_d = d, 1
        rows = max(_SUBLANE, (budget_elems // d_lanes) // _SUBLANE * _SUBLANE)
        bn = n if n <= rows else rows
    grid_n = -(-n // bn)

    # ---- optional split of the reduction axis (keeps both v7x TCs busy) ----
    if num_reduction_chunks is not None:
        n_chunks = int(num_reduction_chunks)
    else:
        n_chunks = 2 if (_num_tensorcores() > 1 and grid_n < 2) else 1
    n_chunks = max(1, min(n_chunks, grid_d))
    bpc = -(-grid_d // n_chunks)                     # blocks per chunk
    skip_dup = (n_chunks * bpc != grid_d)
    needs_mask = (d % td != 0)

    if skip_dup:
        def _dblk(c, k):
            return jnp.minimum(c * bpc + k, grid_d - 1)   # always in-bounds DMA
    else:
        def _dblk(c, k):
            return c * bpc + k

    in_spec = pl.BlockSpec((bn, td), lambda i, c, k: (i, _dblk(c, k)))
    out_spec = pl.BlockSpec((None, bn, 1), lambda i, c, k: (c, i, 0))

    # Explicit VMEM budget: 2 double-buffers of (p-block + t-block) + headroom.
    bn_pad = _round_up(bn, _SUBLANE)
    td_pad = _round_up(td, _LANE)
    block_bytes = bn_pad * td_pad * (isz_p + isz_t)
    vmem_limit = int(min(48 << 20, max(16 << 20, 2 * block_bytes + (4 << 20))))

    kernel = functools.partial(
        _dice_kernel, d=d, td=td, bpc=bpc, grid_d=grid_d,
        needs_mask=needs_mask, skip_dup=skip_dup)

    num, den = pl.pallas_call(
        kernel,
        out_shape=(jax.ShapeDtypeStruct((n_chunks, n, 1), jnp.float32),
                   jax.ShapeDtypeStruct((n_chunks, n, 1), jnp.float32)),
        grid_spec=pltpu.PrefetchScalarGridSpec(
            num_scalar_prefetch=0,
            grid=(grid_n, n_chunks, bpc),
            in_specs=[in_spec, in_spec],
            out_specs=[out_spec, out_spec],
        ),
        compiler_params=pltpu.CompilerParams(
            dimension_semantics=("parallel", "parallel", "arbitrary"),
            vmem_limit_bytes=vmem_limit,
        ),
    )(p2, t2)

    # ---- masked-mean epilogue in plain JAX (cheap XLA ops) ----
    num = jnp.sum(num, axis=0).reshape(n)
    den = jnp.sum(den, axis=0).reshape(n)
    dice_loss = 1.0 - 2.0 * num / (den + jnp.float32(smooth))
    mask = t2[:, 0] != -1
    # NOTE: matches the reference — NaN if every batch entry is masked out.
    cnt = jnp.sum(mask.astype(jnp.float32))
    return jnp.sum(jnp.where(mask, dice_loss, 0.0)) / cnt


def _reference(predict, target, smooth=1):
    n = predict.shape[0]
    p2 = predict.reshape(n, -1).astype(jnp.float32)
    t2 = target.reshape(n, -1).astype(jnp.float32)
    num = jnp.sum(p2 * t2, axis=1)
    den = jnp.sum(p2, axis=1) + jnp.sum(t2, axis=1) + smooth
    dice_loss = 1.0 - 2.0 * num / den
    mask = target.reshape(n, -1)[:, 0] != -1
    return jnp.sum(jnp.where(mask, dice_loss, 0.0)) / jnp.sum(mask.astype(jnp.float32))


if __name__ == "__main__":
    key = jax.random.PRNGKey(0)
    k1, k2, k3, k4 = jax.random.split(key, 4)

    # Case 1: NCHW (batch=2, channels=4, spatial=16x16) -> D=1024,
    # whole-row-per-step path with the generation-default tile budget.
    predict1 = jax.nn.sigmoid(
        jax.random.normal(k1, (2, 4, 16, 16), dtype=jnp.float32))
    target1 = (jax.random.uniform(k2, (2, 4, 16, 16)) > 0.5).astype(jnp.float32)
    loss1 = binary_dice_loss(predict1, target1, smooth=1)
    jax.block_until_ready(loss1)
    ref1 = _reference(predict1, target1, smooth=1)
    assert jnp.allclose(loss1, ref1, rtol=1e-5, atol=1e-6), (loss1, ref1)

    # Case 2: unaligned D (= 5*6*36 = 1080), tiny tile budget to force the
    # tiled-D + masked-tail path, one masked-out batch row, and a forced 2-way
    # reduction split to exercise the v7x dual-chunk code path on any chip.
    predict2 = jax.nn.sigmoid(
        jax.random.normal(k3, (4, 5, 6, 36), dtype=jnp.float32))
    target2 = (jax.random.uniform(k4, (4, 5, 6, 36)) > 0.5).astype(jnp.float32)
    target2 = target2.at[3, 0, 0, 0].set(-1.0)
    loss2 = binary_dice_loss(predict2, target2, smooth=1,
                             target_tile_bytes=4096, num_reduction_chunks=2)
    jax.block_until_ready(loss2)
    ref2 = _reference(predict2, target2, smooth=1)
    assert jnp.allclose(loss2, ref2, rtol=1e-5, atol=1e-6), (loss2, ref2)

    print("KERNEL_OK")
</pallas_src>

<mosaic_0001>
module attributes {stable_mosaic.version = 11 : i64} {
  func.func @_dice_kernel(%arg0: i32, %arg1: i32, %arg2: i32, %arg3: memref<2x1024xf32, #tpu.memory_space<vmem>>, %arg4: memref<2x1024xf32, #tpu.memory_space<vmem>>, %arg5: memref<1x2x1xf32, #tpu.memory_space<vmem>>, %arg6: memref<1x2x1xf32, #tpu.memory_space<vmem>>) attributes {dimension_semantics = [#tpu.dimension_semantics<parallel>, #tpu.dimension_semantics<parallel>, #tpu.dimension_semantics<arbitrary>], iteration_bounds = array<i64: 1, 1, 1>, scalar_prefetch = 0 : i64, scratch_operands = 0 : i64, tpu.core_type = #tpu.core_type<tc>, window_params = [{transform_indices = @transform_0, window_bounds = array<i64: 2, 1024>}, {transform_indices = @transform_1, window_bounds = array<i64: 2, 1024>}, {transform_indices = @transform_2, window_bounds = array<i64: 1, 2, 1>}, {transform_indices = @transform_3, window_bounds = array<i64: 1, 2, 1>}]} {
    %c0_i32 = arith.constant 0 : i32
    %0 = arith.cmpi eq, %arg2, %c0_i32 : i32
    %1 = arith.extui %0 : i1 to i32
    %c0_i32_0 = arith.constant 0 : i32
    %2 = arith.cmpi ne, %1, %c0_i32_0 : i32
    scf.if %2 {
      %cst_17 = arith.constant 0.000000e+00 : f32
      %23 = vector.broadcast %cst_17 : f32 to vector<2x1xf32>
      %c0_18 = arith.constant 0 : index
      %c0_19 = arith.constant 0 : index
      %c0_20 = arith.constant 0 : index
      %24 = vector.load %arg5[%c0_18, %c0_19, %c0_20] : memref<1x2x1xf32, #tpu.memory_space<vmem>>, vector<1x2x1xf32>
      %25 = vector.shape_cast %24 : vector<1x2x1xf32> to vector<2x1xf32>
      %26 = vector.shape_cast %23 : vector<2x1xf32> to vector<1x2x1xf32>
      tpu.vector_store %arg5[%c0_18, %c0_19, %c0_20], %26 {strides = array<i32>} : memref<1x2x1xf32, #tpu.memory_space<vmem>>, vector<1x2x1xf32>,
      %cst_21 = arith.constant 0.000000e+00 : f32
      %27 = vector.broadcast %cst_21 : f32 to vector<2x1xf32>
      %c0_22 = arith.constant 0 : index
      %c0_23 = arith.constant 0 : index
      %c0_24 = arith.constant 0 : index
      %28 = vector.load %arg6[%c0_22, %c0_23, %c0_24] : memref<1x2x1xf32, #tpu.memory_space<vmem>>, vector<1x2x1xf32>
      %29 = vector.shape_cast %28 : vector<1x2x1xf32> to vector<2x1xf32>
      %30 = vector.shape_cast %27 : vector<2x1xf32> to vector<1x2x1xf32>
      tpu.vector_store %arg6[%c0_22, %c0_23, %c0_24], %30 {strides = array<i32>} : memref<1x2x1xf32, #tpu.memory_space<vmem>>, vector<1x2x1xf32>,
    } else {
    }
    %c0 = arith.constant 0 : index
    %c0_1 = arith.constant 0 : index
    %3 = vector.load %arg3[%c0, %c0_1] : memref<2x1024xf32, #tpu.memory_space<vmem>>, vector<2x1024xf32>
    %c0_2 = arith.constant 0 : index
    %c0_3 = arith.constant 0 : index
    %4 = vector.load %arg4[%c0_2, %c0_3] : memref<2x1024xf32, #tpu.memory_space<vmem>>, vector<2x1024xf32>
    %c0_4 = arith.constant 0 : index
    %c0_5 = arith.constant 0 : index
    %c0_6 = arith.constant 0 : index
    %5 = vector.load %arg5[%c0_4, %c0_5, %c0_6] : memref<1x2x1xf32, #tpu.memory_space<vmem>>, vector<1x2x1xf32>
    %6 = vector.shape_cast %5 : vector<1x2x1xf32> to vector<2x1xf32>
    %7 = arith.mulf %3, %4 : vector<2x1024xf32>
    %cst = arith.constant dense<0.000000e+00> : vector<2xf32>
    %8 = vector.multi_reduction <add>, %7, %cst [1] : vector<2x1024xf32> to vector<2xf32>
    %9 = vector.shape_cast %8 : vector<2xf32> to vector<2x1xf32>
    %10 = arith.addf %6, %9 : vector<2x1xf32>
    %c0_7 = arith.constant 0 : index
    %c0_8 = arith.constant 0 : index
    %c0_9 = arith.constant 0 : index
    %11 = vector.load %arg5[%c0_7, %c0_8, %c0_9] : memref<1x2x1xf32, #tpu.memory_space<vmem>>, vector<1x2x1xf32>
    %12 = vector.shape_cast %11 : vector<1x2x1xf32> to vector<2x1xf32>
    %13 = vector.shape_cast %10 : vector<2x1xf32> to vector<1x2x1xf32>
    tpu.vector_store %arg5[%c0_7, %c0_8, %c0_9], %13 {strides = array<i32>} : memref<1x2x1xf32, #tpu.memory_space<vmem>>, vector<1x2x1xf32>,
    %c0_10 = arith.constant 0 : index
    %c0_11 = arith.constant 0 : index
    %c0_12 = arith.constant 0 : index
    %14 = vector.load %arg6[%c0_10, %c0_11, %c0_12] : memref<1x2x1xf32, #tpu.memory_space<vmem>>, vector<1x2x1xf32>
    %15 = vector.shape_cast %14 : vector<1x2x1xf32> to vector<2x1xf32>
    %16 = arith.addf %3, %4 : vector<2x1024xf32>
    %cst_13 = arith.constant dense<0.000000e+00> : vector<2xf32>
    %17 = vector.multi_reduction <add>, %16, %cst_13 [1] : vector<2x1024xf32> to vector<2xf32>
    %18 = vector.shape_cast %17 : vector<2xf32> to vector<2x1xf32>
    %19 = arith.addf %15, %18 : vector<2x1xf32>
    %c0_14 = arith.constant 0 : index
    %c0_15 = arith.constant 0 : index
    %c0_16 = arith.constant 0 : index
    %20 = vector.load %arg6[%c0_14, %c0_15, %c0_16] : memref<1x2x1xf32, #tpu.memory_space<vmem>>, vector<1x2x1xf32>
    %21 = vector.shape_cast %20 : vector<1x2x1xf32> to vector<2x1xf32>
    %22 = vector.shape_cast %19 : vector<2x1xf32> to vector<1x2x1xf32>
    tpu.vector_store %arg6[%c0_14, %c0_15, %c0_16], %22 {strides = array<i32>} : memref<1x2x1xf32, #tpu.memory_space<vmem>>, vector<1x2x1xf32>,
    return
  }
  func.func @transform_0(%arg0: i32, %arg1: i32, %arg2: i32) -> (i32, i32) {
    %c1_i32 = arith.constant 1 : i32
    %0 = arith.muli %arg1, %c1_i32 : i32
    %1 = arith.addi %0, %arg2 : i32
    %c0_i32 = arith.constant 0 : i32
    return %arg0, %1 : i32, i32
  }
  func.func @transform_1(%arg0: i32, %arg1: i32, %arg2: i32) -> (i32, i32) {
    %c1_i32 = arith.constant 1 : i32
    %0 = arith.muli %arg1, %c1_i32 : i32
    %1 = arith.addi %0, %arg2 : i32
    %c0_i32 = arith.constant 0 : i32
    return %arg0, %1 : i32, i32
  }
  func.func @transform_2(%arg0: i32, %arg1: i32, %arg2: i32) -> (i32, i32, i32) {
    %c0_i32 = arith.constant 0 : i32
    %c0_i32_0 = arith.constant 0 : i32
    return %arg1, %arg0, %c0_i32 : i32, i32, i32
  }
  func.func @transform_3(%arg0: i32, %arg1: i32, %arg2: i32) -> (i32, i32, i32) {
    %c0_i32 = arith.constant 0 : i32
    %c0_i32_0 = arith.constant 0 : i32
    return %arg1, %arg0, %c0_i32 : i32, i32, i32
  }
}

</mosaic_0001>

<bundles_post_ra>
// kernel: tpu_custom_call.1
= control target key start
LH: loop header
LB: loop body
LE: loop exit
PB: predicated region body
PF: predicated region fallthrough
CT: control target
= control target key end

     0   :  { %9 = vsyncpa [#allocation3], 0  ;;  %s342_s0 = inlined_call_operand.hbm [shape: f32[2,1024], index: 0, kind: input, shape index: {}]   ;;  %s343_s1 = inlined_call_operand.hbm [shape: f32[2,1024], index: 1, kind: input, shape index: {}]   ;;  %s344_s2 = inlined_call_operand.vmem [shape: f32[1,2,1], index: 2, kind: output, shape index: {0}]   ;;  %s345_s3 = inlined_call_operand.vmem [shape: f32[1,2,1], index: 3, kind: output, shape index: {1}]  }
   0x1   :  { %10 = vsyncpa [#allocation5], 0  ;;  %s256_s12 = smov [#allocation2]   ;;  %s257_s14 = smov [#allocation4]  }
   0x2   :  { %s21_s13 = sshll.u32 %s256_s12, 4  ;;  %s35_s15 = sshll.u32 %s257_s14, 4  ;;  %s22_s13 = int_to_ptr.vmem [resolvable:$true] %s21_s13  ;;  %s36_s15 = int_to_ptr.vmem [resolvable:$true] %s35_s15 }
   0x3   :  { %s208_s18 = scalar_lea.hbm %s342_s0, 256 }
   0x4   :  { %p209_p0 = scmp.ne.s32.totalorder %s342_s0, %s208_s18  ;;  %p212_p1 = scmp.lt.u32.totalorder %s208_s18, %s342_s0 }
   0x6   :  { %p214_p2 = pnand %p212_p1, %p209_p0 }
   0x8   :  { %217 = shalt.err (!%p214_p2)
}
   0x9   :  { %s218_s23 = scalar_lea.vmem %s22_s13, 256  ;;  %p223_p4 = scmp.lt.s32.totalorder %s22_s13, %s22_s13 }
   0xa   :  { %p219_p3 = scmp.ne.s32.totalorder %s22_s13, %s218_s23  ;;  %p224_p5 = scmp.lt.s32.totalorder %s218_s23, %s218_s23 }
   0xc   :  { %p225_p6 = por %p224_p5, %p223_p4 }
   0xe   :  { %p226_p7 = pnand %p225_p6, %p219_p3 }
  0x10   :  { %229 = shalt.err (!%p226_p7)
}
  0x11   :  { %24 = dma.hbm_to_vmem [thread:$0]  %s342_s0, 256, %s22_s13, [#allocation3]  }
  0x12   :  { %s230_s28 = scalar_lea.hbm %s343_s1, 256 }
  0x13   :  { %p231_p8 = scmp.ne.s32.totalorder %s343_s1, %s230_s28  ;;  %p234_p9 = scmp.lt.u32.totalorder %s230_s28, %s343_s1 }
  0x15   :  { %p236_p10 = pnand %p234_p9, %p231_p8 }
  0x17   :  { %239 = shalt.err (!%p236_p10)
}
  0x18   :  { %s240_s6 = scalar_lea.vmem %s36_s15, 256  ;;  %p245_p12 = scmp.lt.s32.totalorder %s36_s15, %s36_s15 }
  0x19   :  { %p241_p11 = scmp.ne.s32.totalorder %s36_s15, %s240_s6  ;;  %p246_p13 = scmp.lt.s32.totalorder %s240_s6, %s240_s6 }
  0x1b   :  { %p247_p0 = por %p246_p13, %p245_p12 }
  0x1d   :  { %p248_p1 = pnand %p247_p0, %p241_p11 }
  0x1f   :  { %251 = shalt.err (!%p248_p1)
}
  0x20   :  { %38 = dma.hbm_to_vmem [thread:$0]  %s343_s1, 256, %s36_s15, [#allocation5]  }
  0x21   :  { %252 = dma.done.wait [#allocation3], 256  }
  0x22   :  { %253 = vsyncadd [#allocation3], 4294967040 }
  0x23   :  { %254 = dma.done.wait [#allocation5], 256  }
  0x24   :  { %255 = vsyncadd [#allocation5], 4294967040  ;;  %v69_v0 = vlaneseq  ;;  %vm53_vm0 = vcmask 1024   ;;  %v258_v1 = vmov 1983009808   ;;  %v259_v4 = vmov 0.0  }
  0x25   :  { %v67_v2 = vunpack.c.l.s4 %v258_v1  ;;  %54 = vst.msk [vmem:[%s344_s2] sm:$0x3] %vm53_vm0, %v259_v4  ;;  %55 = vst.msk [vmem:[%s345_s3] sm:$0x3] %vm53_vm0, %v259_v4  ;;  %v56_v7 = vld [vmem:[#allocation2] sm:$0xff]  ;;  %v57_v8 = vld [vmem:[#allocation2 + $0x8] sm:$0xff] }
  0x26   :  { %v70_v3 = vshrl.u32 %v69_v0, 7  ;;  %v58_v9 = vld [vmem:[#allocation4] sm:$0xff]  ;;  %v59_v10 = vld [vmem:[#allocation4 + $0x8] sm:$0xff]  ;;  %vm107_vm1 = vcmask 1041408  }
  0x27   :  { %v68_v5 = vunpack.c.0.s8 %v67_v2  ;;  %v61_v11 = vmul.f32 %v58_v9, %v56_v7  ;;  %v129_v12 = vadd.f32 %v58_v9, %v56_v7  ;;  %v62_v13 = vmul.f32 %v59_v10, %v57_v8 }
  0x28   :  { %v130_v20 = vadd.f32 %v59_v10, %v57_v8 }
  0x29   :  { %v71_v6 = vsub.s32 %v68_v5, %v70_v3  ;;  %v65_v14 = vcombine.high %v61_v11, %v61_v11  ;;  %v133_v16 = vcombine.high %v129_v12, %v129_v12  ;;  %v82_v18 = vcombine.high %v62_v13, %v62_v13 }
  0x2a   :  { %v150_v31 = vcombine.high %v130_v20, %v130_v20 }
  0x2b   :  { %v72_v15 = vrot.slane %v61_v11, %v71_v6  ;;  %v140_v17 = vrot.slane %v129_v12, %v71_v6  ;;  %v89_v19 = vrot.slane %v62_v13, %v71_v6  ;;  %v79_v21 = vrot.slane %v65_v14, %v71_v6 }
  0x2c   :  { %v147_v24 = vrot.slane %v133_v16, %v71_v6  ;;  %v157_v32 = vrot.slane %v130_v20, %v71_v6  ;;  %v96_v33 = vrot.slane %v82_v18, %v71_v6  ;;  %v164_v43 = vrot.slane %v150_v31, %v71_v6  ;;  %v60_v1 = vld [vmem:[%s344_s2] sm:$0x3] }
  0x2d   :  { %v80_v22 = vcombine.high %v72_v15, %v72_v15  ;;  %v108_v23 = vsel %vm107_vm1, %v72_v15, 0.0  ;;  %v148_v25 = vcombine.high %v140_v17, %v140_v17  ;;  %v81_v26 = vcombine.high %v79_v21, %v79_v21  ;;  %v128_v4 = vld [vmem:[%s345_s3] sm:$0x3] }
  0x2e   :  { %v111_v28 = vsel %vm107_vm1, %v79_v21, 0.0  ;;  %v149_v30 = vcombine.high %v147_v24, %v147_v24  ;;  %v97_v34 = vcombine.high %v89_v19, %v89_v19  ;;  %v175_v36 = vsel %vm107_vm1, %v140_v17, 0.0 }
  0x2f   :  { %v109_v27 = vsel %vm107_vm1, %v80_v22, 0.0  ;;  %v113_v35 = vsel %vm107_vm1, %v81_v26, 0.0  ;;  %v176_v38 = vsel %vm107_vm1, %v148_v25, 0.0  ;;  %v178_v39 = vsel %vm107_vm1, %v147_v24, 0.0 }
  0x30   :  { %v110_v29 = vadd.f32 %v109_v27, %v108_v23  ;;  %v115_v40 = vsel %vm107_vm1, %v89_v19, 0.0  ;;  %v177_v41 = vadd.f32 %v176_v38, %v175_v36  ;;  %v165_v44 = vcombine.high %v157_v32, %v157_v32 }
  0x31   :  { %v180_v45 = vsel %vm107_vm1, %v149_v30, 0.0  ;;  %v98_v46 = vcombine.high %v96_v33, %v96_v33  ;;  %v117_v47 = vsel %vm107_vm1, %v97_v34, 0.0  ;;  %v182_v50 = vsel %vm107_vm1, %v157_v32, 0.0 }
  0x32   :  { %v112_v37 = vadd.f32 %v111_v28, %v110_v29  ;;  %v179_v48 = vadd.f32 %v178_v39, %v177_v41  ;;  %v119_v51 = vsel %vm107_vm1, %v96_v33, 0.0  ;;  %v166_v54 = vcombine.high %v164_v43, %v164_v43 }
  0x33   :  { %v184_v55 = vsel %vm107_vm1, %v165_v44, 0.0  ;;  %v121_v56 = vsel %vm107_vm1, %v98_v46, 0.0  ;;  %v186_v59 = vsel %vm107_vm1, %v164_v43, 0.0 }
  0x34   :  { %v114_v42 = vadd.f32 %v113_v35, %v112_v37  ;;  %v181_v52 = vadd.f32 %v180_v45, %v179_v48  ;;  %v188_v62 = vsel %vm107_vm1, %v166_v54, 0.0 }
  0x36   :  { %v116_v49 = vadd.f32 %v115_v40, %v114_v42  ;;  %v183_v57 = vadd.f32 %v182_v50, %v181_v52 }
  0x38   :  { %v118_v53 = vadd.f32 %v117_v47, %v116_v49  ;;  %v185_v60 = vadd.f32 %v184_v55, %v183_v57 }
  0x3a   :  { %v120_v58 = vadd.f32 %v119_v51, %v118_v53  ;;  %v187_v63 = vadd.f32 %v186_v59, %v185_v60 }
  0x3c   :  { %v122_v61 = vadd.f32 %v121_v56, %v120_v58  ;;  %v189_v0 = vadd.f32 %v188_v62, %v187_v63 }
  0x3e   :  { %123 = vadd.xlane.f32.xlu0 %v122_v61 }
  0x42   :  { %190 = vadd.xlane.f32.xlu0 %v189_v0 }
  0xcb   :  { %v124_v2 = vpop.xlane.xlu0 %123 }
  0xcc   :  { %v125_v3 = vadd.f32 %v124_v2, %v60_v1 }
  0xce   :  { %127 = vst.msk [vmem:[%s344_s2] sm:$0x3] %vm53_vm0, %v125_v3 }
  0xcf   :  { %v191_v5 = vpop.xlane.xlu0 %190 }
  0xd0   :  { %v192_v6 = vadd.f32 %v191_v5, %v128_v4 }
  0xd2   :  { %193 = vst.msk [vmem:[%s345_s3] sm:$0x3] %vm53_vm0, %v192_v6 }
  0xd3   :  { %202 = vsyncpa [#allocation3], 1 }
  0xd4   :  { %203 = vsyncpa [#allocation5], 1 }

</bundles_post_ra>
